<compile_context>
chip_gen: v7x
topology: tpu7x:2x2x1
jax: 0.10.0
libtpu: 0.0.40
codegen_flags: <defaults>
</compile_context>

<pallas_src>
import math

import numpy as np

import jax
import jax.numpy as jnp
from jax.experimental import pallas as pl
from jax.experimental.pallas import tpu as pltpu

# ---- RadPolyTrig configuration (matches the module __init__ args) ----
MAX_SH = 3                                   # -> L = max_sh + 1 linear layers
TRIG_BASIS = 3
RPOW = 3
NUM_RAD = (TRIG_BASIS + 1) * (RPOW + 1)      # 16
F = 2 * NUM_RAD                              # 32  (input dim of each Linear)
NUM_CHANNELS = 4
OUT_DIM = 2 * NUM_CHANNELS                   # 8   (mix='cplx' -> 2*num_channels)
L = MAX_SH + 1                               # 4
FUSED_OUT = L * OUT_DIM                      # 32  (all L linears fused)
PI = math.pi

PACK = 4                                     # logical rows packed per vreg row
FEAT_LANES = PACK * F                        # 128 fully dense feature lanes
OUT_LANES = PACK * FUSED_OUT                 # 128 fully dense output lanes
ROW_ALIGN = 8 * PACK                         # 32 logical rows = 8 packed sublanes
MAX_TILE_M = 16384                           # hard cap -> ~18 MiB VMEM footprint

# scales / phases exactly as in the module __init__ (nn.Parameter init values).
_scales_np = np.concatenate([np.arange(TRIG_BASIS + 1),
                             np.arange(TRIG_BASIS + 1)]).astype(np.float32)
_phases_np = np.concatenate([np.zeros(TRIG_BASIS + 1),
                             (PI / 2) * np.ones(TRIG_BASIS + 1)]).astype(np.float32)
_phases_np[0] = PI / 2
SCALES_FULL = jnp.asarray(_scales_np)        # (2*(trig_basis+1),)
PHASES_FULL = jnp.asarray(_phases_np)

# 0/1 lane-expansion matrix: EXPAND[j, j*F + f] = 1, so
# (r4 @ EXPAND)[g, j*F + f] = r[4g + j]  (exact in f32).
EXPAND = jnp.asarray(np.kron(np.eye(PACK, dtype=np.float32),
                             np.ones((1, F), dtype=np.float32)))        # (4, 128)


def _build_coef(scales, phases):
    """Per-feature constant table, tiled PACK times along the 128 lanes.

    Feature index f = t*(RPOW+1) + p:
      row 0          : 2*pi*scale_f
      row 1          : phase_f
      rows 2..2+RPOW : one-hot selector for p == f % (RPOW+1)
    Padded to 8 sublanes.
    """
    scale_f = jnp.repeat(2.0 * PI * scales.astype(jnp.float32), RPOW + 1)   # (F,)
    phase_f = jnp.repeat(phases.astype(jnp.float32), RPOW + 1)              # (F,)
    f_idx = jnp.arange(F)
    sel = jnp.stack([(f_idx % (RPOW + 1) == p).astype(jnp.float32)
                     for p in range(RPOW + 1)])                             # (RPOW+1, F)
    coef = jnp.concatenate([scale_f[None], phase_f[None], sel], axis=0)     # (2+RPOW+1, F)
    coef = jnp.tile(coef, (1, PACK))                                        # (., 128)
    pad_rows = (-coef.shape[0]) % 8
    return jnp.pad(coef, ((0, pad_rows), (0, 0)))                           # (8, 128)


def radpolytrig_kernel(r4_ref, expand_ref, coef_ref, w_ref, b_ref, out_ref):
    """One row tile; PACK=4 logical rows per fully lane-dense 128-lane row.

    r4_ref     : (tile4, PACK)   masked radii (0 => masked edge / pad row)
    expand_ref : (PACK, 128)     0/1 lane-broadcast matrix
    coef_ref   : (8, 128)        [2*pi*scale; phase; one-hot p-selectors] x4
    w_ref      : (128, 128)      block-diagonal fused weights (4 x 32x32)
    b_ref      : (1, 128)        fused bias tiled x4
    out_ref    : (tile4, 128)
    """
    # Broadcast each packed row's 4 radii across their 32 feature lanes on the
    # (otherwise idle) MXU: exact in f32, keeps the HBM read at 4 B/row.
    rbc = jnp.dot(r4_ref[...], expand_ref[...],
                  preferred_element_type=jnp.float32)                # (tile4, 128)
    mask = rbc > 0.0

    # Trig part: sin(2*pi*scale_f * r + phase_f) on fully dense lanes.
    trig = jnp.sin(rbc * coef_ref[pl.ds(0, 1), :] + coef_ref[pl.ds(1, 1), :])

    # Power part: r^{-(f % (RPOW+1))} via Horner over one-hot selector rows
    # (no materialized ones tensor, no per-power where).
    safe = jnp.where(mask, rbc, 1.0)
    rinv = 1.0 / safe
    pow_part = coef_ref[pl.ds(2 + RPOW, 1), :]
    for p in range(RPOW - 1, -1, -1):
        pow_part = pow_part * rinv + coef_ref[pl.ds(2 + p, 1), :]

    feat = jnp.where(mask, trig * pow_part, 0.0)                     # (tile4, 128)

    # All L fused linear layers for 4 rows in one clean 128x128 MXU matmul.
    out = jnp.dot(feat, w_ref[...], preferred_element_type=jnp.float32) + b_ref[...]
    out_ref[...] = out.astype(out_ref.dtype)


def rad_poly_trig(norms, edge_mask, weights, biases, scales=None, phases=None,
                  tile_m=8192, out_dtype=jnp.float32):
    """Pallas wrapper reproducing RadPolyTrig.forward (mix='cplx')."""
    if scales is None:
        scales = SCALES_FULL
    if phases is None:
        phases = PHASES_FULL

    s = norms.shape
    M = math.prod(s)

    # Row tile (in logical rows): cap at half the (aligned) problem so the
    # grid has >= 2 "parallel" steps whenever possible (v7x megacore), plus a
    # hard cap that keeps the VMEM footprint well under the explicit limit.
    half_aligned = -(-(-(-M // 2)) // ROW_ALIGN) * ROW_ALIGN
    tile_m = min(int(tile_m), MAX_TILE_M, half_aligned)
    tile_m = max(ROW_ALIGN, (tile_m // ROW_ALIGN) * ROW_ALIGN)
    M_pad = -(-M // tile_m) * tile_m
    tile4 = tile_m // PACK
    m4 = M_pad // PACK

    # Merge the mask into the single per-row input: r_eff = r for valid edges,
    # 0 otherwise; the kernel recovers the mask as r_eff > 0.  Padded tail
    # rows are 0 -> bias-only outputs that get sliced off below.
    valid = (edge_mask != 0) & (norms > 0)
    r_eff = jnp.where(valid, norms, 0.0).astype(jnp.float32).reshape(M)
    if M_pad != M:
        r_eff = jnp.pad(r_eff, (0, M_pad - M))
    r4 = r_eff.reshape(m4, PACK)

    # Fuse the L mixing layers into one (F, L*OUT_DIM) weight, then replicate
    # block-diagonally so 4 packed rows share one 128x128 matmul.
    w_cat = jnp.concatenate([w.astype(jnp.float32) for w in weights], axis=1)  # (32, 32)
    w_bd = jnp.kron(jnp.eye(PACK, dtype=jnp.float32), w_cat)                   # (128, 128)
    b_cat = jnp.concatenate([b.astype(jnp.float32) for b in biases])           # (32,)
    b_bd = jnp.tile(b_cat, PACK).reshape(1, OUT_LANES)                         # (1, 128)

    coef = _build_coef(scales, phases)                                         # (8, 128)

    grid = (m4 // tile4,)
    out = pl.pallas_call(
        radpolytrig_kernel,
        out_shape=jax.ShapeDtypeStruct((m4, OUT_LANES), out_dtype),
        grid_spec=pltpu.PrefetchScalarGridSpec(
            num_scalar_prefetch=0,
            grid=grid,
            in_specs=[
                pl.BlockSpec((tile4, PACK), lambda i: (i, 0)),          # packed radii
                pl.BlockSpec((PACK, FEAT_LANES), lambda i: (0, 0)),     # lane expansion
                pl.BlockSpec((8, FEAT_LANES), lambda i: (0, 0)),        # coef table
                pl.BlockSpec((FEAT_LANES, OUT_LANES), lambda i: (0, 0)),  # block-diag W
                pl.BlockSpec((1, OUT_LANES), lambda i: (0, 0)),         # bias
            ],
            out_specs=pl.BlockSpec((tile4, OUT_LANES), lambda i: (i, 0)),
        ),
        compiler_params=pltpu.CompilerParams(
            dimension_semantics=("parallel",),
            vmem_limit_bytes=40 * 1024 * 1024,
        ),
    )(r4, EXPAND, coef, w_bd, b_bd)

    # (M_pad/4, 128) -> (M_pad, 32) is memory-order preserving (free reshape).
    # Fused column c = l*OUT_DIM + n*2 + k -> reshape to (L, NC, 2) and split
    # into the L radial functions (list return mirrors the module).
    out = out.reshape(M_pad, FUSED_OUT)[:M].reshape(s + (L, NUM_CHANNELS, 2))
    return [out[..., l, :, :] for l in range(L)]


def rad_poly_trig_ref(norms, edge_mask, weights, biases):
    """Pure-JAX transliteration of RadPolyTrig.forward (mix='cplx')."""
    s = norms.shape
    mask = ((edge_mask != 0) & (norms > 0))[..., None]                       # s+(1,)
    r = norms[..., None]
    safe = jnp.where(mask, r, 1.0)
    rad_powers = jnp.stack(
        [jnp.where(mask, safe ** (-p), 0.0) for p in range(RPOW + 1)],
        axis=-1)                                                             # s+(1,RPOW+1)
    rad_trig = jnp.where(
        mask, jnp.sin(2 * PI * SCALES_FULL * r + PHASES_FULL), 0.0)[..., None]
    rad_prod = (rad_powers * rad_trig).reshape(s + (1, F))
    return [(rad_prod @ W + b).reshape(s + (NUM_CHANNELS, 2))
            for W, b in zip(weights, biases)]


if __name__ == "__main__":
    key = jax.random.PRNGKey(0)
    keys = jax.random.split(key, 2 + 2 * L)
    k_norm, k_mask, k_param = keys[0], keys[1], keys[2:]

    B, N = 2, 8                                   # s = (batch, natoms, natoms)
    norms = jnp.abs(jax.random.normal(k_norm, (B, N, N), dtype=jnp.float32)) + 0.1
    norms = norms * (1.0 - jnp.eye(N, dtype=jnp.float32)[None])   # zero self-edges
    edge_mask = (jax.random.uniform(k_mask, (B, N, N)) > 0.2).astype(jnp.float32)

    # deterministic nn.Linear-style init for the L mixing layers
    bound = 1.0 / math.sqrt(F)
    weights = [jax.random.uniform(k_param[2 * l], (F, OUT_DIM),
                                  minval=-bound, maxval=bound, dtype=jnp.float32)
               for l in range(L)]
    biases = [jax.random.uniform(k_param[2 * l + 1], (OUT_DIM,),
                                 minval=-bound, maxval=bound, dtype=jnp.float32)
              for l in range(L)]

    refs = rad_poly_trig_ref(norms, edge_mask, weights, biases)

    # 1) default tile (auto-capped so the grid has >= 2 parallel steps)
    outs = rad_poly_trig(norms, edge_mask, weights, biases)
    outs = [jax.block_until_ready(o) for o in outs]
    for o, r in zip(outs, refs):
        assert o.shape == r.shape == (B, N, N, NUM_CHANNELS, 2)
        assert jnp.allclose(o, r, rtol=1e-4, atol=2e-5), \
            float(jnp.max(jnp.abs(o - r)))

    # 2) small tile -> exercises a longer multi-step ("parallel") grid
    outs2 = rad_poly_trig(norms, edge_mask, weights, biases, tile_m=32)
    outs2 = [jax.block_until_ready(o) for o in outs2]
    for o, r in zip(outs2, refs):
        assert jnp.allclose(o, r, rtol=1e-4, atol=2e-5), \
            float(jnp.max(jnp.abs(o - r)))

    # 3) optional bfloat16 output path (cast only at the final store)
    outs3 = rad_poly_trig(norms, edge_mask, weights, biases, out_dtype=jnp.bfloat16)
    outs3 = [jax.block_until_ready(o) for o in outs3]
    for o, r in zip(outs3, refs):
        assert o.dtype == jnp.bfloat16
        assert jnp.allclose(o.astype(jnp.float32), r, rtol=2e-2, atol=2e-2), \
            float(jnp.max(jnp.abs(o.astype(jnp.float32) - r)))

    print("KERNEL_OK")
</pallas_src>

<mosaic_0001>
module attributes {stable_mosaic.version = 11 : i64} {
  func.func @radpolytrig_kernel(%arg0: i32, %arg1: memref<16x4xf32, #tpu.memory_space<vmem>>, %arg2: memref<4x128xf32, #tpu.memory_space<vmem>>, %arg3: memref<8x128xf32, #tpu.memory_space<vmem>>, %arg4: memref<128x128xf32, #tpu.memory_space<vmem>>, %arg5: memref<1x128xf32, #tpu.memory_space<vmem>>, %arg6: memref<16x128xf32, #tpu.memory_space<vmem>>) attributes {dimension_semantics = [#tpu.dimension_semantics<parallel>], iteration_bounds = array<i64: 2>, scalar_prefetch = 0 : i64, scratch_operands = 0 : i64, tpu.core_type = #tpu.core_type<tc>, window_params = [{transform_indices = @transform_0, window_bounds = array<i64: 16, 4>}, {pipeline_mode = #tpu.pipeline_mode<synchronous>, transform_indices = @transform_1, window_bounds = array<i64: 4, 128>}, {pipeline_mode = #tpu.pipeline_mode<synchronous>, transform_indices = @transform_2, window_bounds = array<i64: 8, 128>}, {pipeline_mode = #tpu.pipeline_mode<synchronous>, transform_indices = @transform_3, window_bounds = array<i64: 128, 128>}, {pipeline_mode = #tpu.pipeline_mode<synchronous>, transform_indices = @transform_4, window_bounds = array<i64: 1, 128>}, {transform_indices = @transform_5, window_bounds = array<i64: 16, 128>}]} {
    %c0 = arith.constant 0 : index
    %c0_0 = arith.constant 0 : index
    %0 = vector.load %arg1[%c0, %c0_0] : memref<16x4xf32, #tpu.memory_space<vmem>>, vector<16x4xf32>
    %c0_1 = arith.constant 0 : index
    %c0_2 = arith.constant 0 : index
    %1 = vector.load %arg2[%c0_1, %c0_2] : memref<4x128xf32, #tpu.memory_space<vmem>>, vector<4x128xf32>
    %cst = arith.constant dense<0.000000e+00> : vector<16x128xf32>
    %2 = tpu.matmul %0, %1, %cst {dimension_numbers = #tpu.dot_dimension_numbers<[1], [0], [0], [1], [0, 0, 1, 1], [], []>} : vector<16x4xf32>, vector<4x128xf32>, vector<16x128xf32> -> vector<16x128xf32>
    %cst_3 = arith.constant 0.000000e+00 : f32
    %3 = vector.broadcast %cst_3 : f32 to vector<16x128xf32>
    %4 = arith.cmpf ogt, %2, %3 : vector<16x128xf32>
    %c0_4 = arith.constant 0 : index
    %c0_5 = arith.constant 0 : index
    %5 = vector.load %arg3[%c0_4, %c0_5] : memref<8x128xf32, #tpu.memory_space<vmem>>, vector<1x128xf32>
    %6 = vector.broadcast %5 : vector<1x128xf32> to vector<16x128xf32>
    %7 = arith.mulf %2, %6 : vector<16x128xf32>
    %c1 = arith.constant 1 : index
    %c0_6 = arith.constant 0 : index
    %8 = vector.load %arg3[%c1, %c0_6] : memref<8x128xf32, #tpu.memory_space<vmem>>, vector<1x128xf32>
    %9 = vector.broadcast %8 : vector<1x128xf32> to vector<16x128xf32>
    %10 = arith.addf %7, %9 : vector<16x128xf32>
    %11 = math.sin %10 : vector<16x128xf32>
    %cst_7 = arith.constant 1.000000e+00 : f32
    %12 = vector.broadcast %cst_7 : f32 to vector<16x128xf32>
    %13 = arith.select %4, %2, %12 : vector<16x128xi1>, vector<16x128xf32>
    %cst_8 = arith.constant 1.000000e+00 : f32
    %14 = vector.broadcast %cst_8 : f32 to vector<16x128xf32>
    %15 = arith.divf %14, %13 : vector<16x128xf32>
    %c5 = arith.constant 5 : index
    %c0_9 = arith.constant 0 : index
    %16 = vector.load %arg3[%c5, %c0_9] : memref<8x128xf32, #tpu.memory_space<vmem>>, vector<1x128xf32>
    %17 = vector.broadcast %16 : vector<1x128xf32> to vector<16x128xf32>
    %18 = arith.mulf %17, %15 : vector<16x128xf32>
    %c4 = arith.constant 4 : index
    %c0_10 = arith.constant 0 : index
    %19 = vector.load %arg3[%c4, %c0_10] : memref<8x128xf32, #tpu.memory_space<vmem>>, vector<1x128xf32>
    %20 = vector.broadcast %19 : vector<1x128xf32> to vector<16x128xf32>
    %21 = arith.addf %18, %20 : vector<16x128xf32>
    %22 = arith.mulf %21, %15 : vector<16x128xf32>
    %c3 = arith.constant 3 : index
    %c0_11 = arith.constant 0 : index
    %23 = vector.load %arg3[%c3, %c0_11] : memref<8x128xf32, #tpu.memory_space<vmem>>, vector<1x128xf32>
    %24 = vector.broadcast %23 : vector<1x128xf32> to vector<16x128xf32>
    %25 = arith.addf %22, %24 : vector<16x128xf32>
    %26 = arith.mulf %25, %15 : vector<16x128xf32>
    %c2 = arith.constant 2 : index
    %c0_12 = arith.constant 0 : index
    %27 = vector.load %arg3[%c2, %c0_12] : memref<8x128xf32, #tpu.memory_space<vmem>>, vector<1x128xf32>
    %28 = vector.broadcast %27 : vector<1x128xf32> to vector<16x128xf32>
    %29 = arith.addf %26, %28 : vector<16x128xf32>
    %30 = arith.mulf %11, %29 : vector<16x128xf32>
    %cst_13 = arith.constant 0.000000e+00 : f32
    %31 = vector.broadcast %cst_13 : f32 to vector<16x128xf32>
    %32 = arith.select %4, %30, %31 : vector<16x128xi1>, vector<16x128xf32>
    %c0_14 = arith.constant 0 : index
    %c0_15 = arith.constant 0 : index
    %33 = vector.load %arg4[%c0_14, %c0_15] : memref<128x128xf32, #tpu.memory_space<vmem>>, vector<128x128xf32>
    %cst_16 = arith.constant dense<0.000000e+00> : vector<16x128xf32>
    %34 = tpu.matmul %32, %33, %cst_16 {dimension_numbers = #tpu.dot_dimension_numbers<[1], [0], [0], [1], [0, 0, 1, 1], [], []>} : vector<16x128xf32>, vector<128x128xf32>, vector<16x128xf32> -> vector<16x128xf32>
    %c0_17 = arith.constant 0 : index
    %c0_18 = arith.constant 0 : index
    %35 = vector.load %arg5[%c0_17, %c0_18] : memref<1x128xf32, #tpu.memory_space<vmem>>, vector<1x128xf32>
    %36 = vector.broadcast %35 : vector<1x128xf32> to vector<16x128xf32>
    %37 = arith.addf %34, %36 : vector<16x128xf32>
    %c0_19 = arith.constant 0 : index
    %c0_20 = arith.constant 0 : index
    %38 = vector.load %arg6[%c0_19, %c0_20] : memref<16x128xf32, #tpu.memory_space<vmem>>, vector<16x128xf32>
    tpu.vector_store %arg6[%c0_19, %c0_20], %37 {strides = array<i32>} : memref<16x128xf32, #tpu.memory_space<vmem>>, vector<16x128xf32>,
    return
  }
  func.func @transform_0(%arg0: i32) -> (i32, i32) {
    %c0_i32 = arith.constant 0 : i32
    %c0_i32_0 = arith.constant 0 : i32
    return %arg0, %c0_i32 : i32, i32
  }
  func.func @transform_1(%arg0: i32) -> (i32, i32) {
    %c0_i32 = arith.constant 0 : i32
    %c0_i32_0 = arith.constant 0 : i32
    %c0_i32_1 = arith.constant 0 : i32
    return %c0_i32, %c0_i32_0 : i32, i32
  }
  func.func @transform_2(%arg0: i32) -> (i32, i32) {
    %c0_i32 = arith.constant 0 : i32
    %c0_i32_0 = arith.constant 0 : i32
    %c0_i32_1 = arith.constant 0 : i32
    return %c0_i32, %c0_i32_0 : i32, i32
  }
  func.func @transform_3(%arg0: i32) -> (i32, i32) {
    %c0_i32 = arith.constant 0 : i32
    %c0_i32_0 = arith.constant 0 : i32
    %c0_i32_1 = arith.constant 0 : i32
    return %c0_i32, %c0_i32_0 : i32, i32
  }
  func.func @transform_4(%arg0: i32) -> (i32, i32) {
    %c0_i32 = arith.constant 0 : i32
    %c0_i32_0 = arith.constant 0 : i32
    %c0_i32_1 = arith.constant 0 : i32
    return %c0_i32, %c0_i32_0 : i32, i32
  }
  func.func @transform_5(%arg0: i32) -> (i32, i32) {
    %c0_i32 = arith.constant 0 : i32
    %c0_i32_0 = arith.constant 0 : i32
    return %arg0, %c0_i32 : i32, i32
  }
}

</mosaic_0001>

<bundles_post_ra>
// kernel: tpu_custom_call.1
= control target key start
LH: loop header
LB: loop body
LE: loop exit
PB: predicated region body
PF: predicated region fallthrough
CT: control target
= control target key end

     0   :  { %10 = vsyncpa [#allocation3], 0  ;;  %s1404_s0 = inlined_call_operand.vmem [shape: f32[32,4], index: 0, kind: input, shape index: {}]   ;;  %s1405_s1 = inlined_call_operand.vmem [shape: f32[4,128], index: 1, kind: input, shape index: {}]   ;;  %s1406_s2 = inlined_call_operand.vmem [shape: f32[8,128], index: 2, kind: input, shape index: {}]   ;;  %s1407_s3 = inlined_call_operand.hbm [shape: f32[128,128], index: 3, kind: input, shape index: {}]   ;;  %s1408_s4 = inlined_call_operand.vmem [shape: f32[1,128], index: 4, kind: input, shape index: {}]   ;;  %s1409_s5 = inlined_call_operand.hbm [shape: f32[32,128], index: 5, kind: output, shape index: {}]  }
   0x1   :  { %11 = vsyncpa [#allocation4], 0 }
   0x2   :  { %13 = vsyncpa [#allocation4 + $0x1], 0  ;;  %s1130_s18 = smov 0   ;;  %s1132_s19 = smov 0  }
   0x3   :  { %s1134_s20 = smov 0   ;;  %s1136_s21 = smov 0  }
   0x4 LB: > { %s1151_s22 = sadd.s32 4294967295, %s1086_s21   ;;  %s784_s23 = sadd.s32 4294967294, %s1086_s21   ;;  %s1086_s21 = sphi %s1136_s21, %s1429_s21   ;;  %s1082_s20 = sphi %s1134_s20, %s1428_s20   ;;  %s1078_s19 = sphi %s1132_s19, %s1427_s19   ;;  %s1074_s18 = sphi %s1130_s18, %s1426_s18  }
   0x5   : > { %s1155_s24 = sadd.s32 1, %s1086_s21   ;;  %s136_s25 = sadd.s32 1, %s1082_s20 }
   0x6   : > { %s133_s26 = ssub.s32 %s1086_s21, %s1155_s24  ;;  %p146_p0 = scmp.ne.s32.totalorder %s1082_s20, %s1078_s19 }
   0x7   : > { %p134_p1 = scmp.eq.s32.totalorder %s133_s26, 0  ;;  %p147_p2 = scmp.eq.s32.totalorder %s1151_s22, 1 }
   0x8   : > { %p152_p3 = scmp.ne.s32.totalorder %s1078_s19, %s1074_s18  ;;  %p153_p4 = scmp.eq.s32.totalorder %s784_s23, 1 }
   0x9   : > { %s1166_s27 = scalar_select %p134_p1, %s1082_s20, %s136_s25  }
   0xa   : > { %p1168_p5 = por %p147_p2, %p146_p0  ;;  %p1172_p6 = por %p153_p4, %p152_p3 }
   0xb   : > { %p785_p7 = scmp.ge.s32.totalorder %s1086_s21, 1  ;;  %p160_p8 = scmp.lt.s32.totalorder %s1086_s21, 3 }
   0xc   : > { %s1413_s28 = scalar_select %p1168_p5, 1, 0 }
   0xd   : > { %s1414_s29 = scalar_select %p1172_p6, 1, 0 }
   0xe   : > { %p1410_p9 = scmp.eq.s32.totalorder %s1151_s22, 0  ;;  %p1179_p10 = pnand %p785_p7, %p160_p8 }
   0xf   : > { %s1088_s6 = smov [#allocation2]   ;;  %s992_s11 = scalar_lea.hbm %s1407_s3, 2048 }
  0x10   : > { %s1415_s30 = scalar_select %p1179_p10, 1, 0 }
  0x11   : > { %s178_s7 = sshll.u32 %s1088_s6, 4  ;;  %p926_p11 = pneg %p1179_p10  ;;  %s179_s7 = int_to_ptr.vmem [resolvable:$true] %s178_s7 }
  0x12   : > { %p993_p13 = scmp.ne.s32.totalorder %s1407_s3, %s992_s11  ;;  %p999_p3 = scmp.lt.u32.totalorder %s992_s11, %s1407_s3 }
  0x13   : > { %p1187_p12 = pnand %p1410_p9, %p926_p11 }
  0x15   : > { %p994_p0 = pneg %p1187_p12 }
  0x17   : > { %p995_p1 = pnand %p994_p0, %p993_p13 }
  0x19   : > { %p996_p2 = pneg %p995_p1 }
  0x1b   : > { %p1001_p4 = pnand %p999_p3, %p996_p2 }
  0x1d   : > { %1004 = shalt.err (!%p1001_p4)
}
  0x1e   : > { %s1005_s16 = scalar_lea.vmem %s179_s7, 2048  ;;  %p1013_p9 = scmp.lt.s32.totalorder %s179_s7, %s179_s7 }
  0x1f   : > { %p1006_p7 = scmp.ne.s32.totalorder %s179_s7, %s1005_s16  ;;  %p1014_p6 = scmp.lt.s32.totalorder %s1005_s16, %s1005_s16 }
  0x21   : > { %p1008_p8 = pnand %p1006_p7, %p994_p0  ;;  %p1015_p5 = por %p1014_p6, %p1013_p9 }
  0x23   : > { %p1009_p11 = pneg %p1008_p8 }
  0x25   : > { %p1016_p10 = pnand %p1015_p5, %p1009_p11 }
  0x27   : > { %1019 = shalt.err (!%p1016_p10)
}
  0x28   : > { %s1089_s17 = smov 128   ;;  %s1090_s23 = smov 8  }
  0x29   : > { %929 = dma.hbm_to_vmem [thread:$0]  (!%p1187_p12), %s1407_s3, 2048, %s179_s7, [#allocation3], %s1089_s17, %s1089_s17, %s1090_s23  }
  0x2a   : > { %p1417_p13 = scmp.ne.s32.totalorder %s1415_s30, 0 }
  0x2b   : > { %p1418_p1 = scmp.eq.s32.totalorder (!%p1417_p13), %s1151_s22, 0 }
  0x2c   : > { %206 = sbr.rel (%p1417_p13) target bundleno = 598 (0x256), region = 40 }
  0x33   : > { %1065 = dma.done.wait (%p1418_p1), [#allocation3], 2048   ;;  %p1419_p0 = pmov %p1418_p1 }
  0x34   : > { %s791_s6 = sshll.u32 %s1151_s22, 1  ;;  %vm251_vm0 = vcmask 1043456   ;;  %vm244_vm1 = vcmask 31744   ;;  %v243_v0 = vld [vmem:[%s1405_s1] sm:$0xf]  ;;  %v597_v4 = vld [vmem:[#allocation2 + $0x8] sm:$0xff] }
  0x35   : > { %1067 = vsyncadd (%p1419_p0), [#allocation3], 4294965248  ;;  %p235_p5 = scmp.lt.s32.totalorder %s791_s6, 3  ;;  %840 = vmatprep.subr.msk.mxu0 %vm251_vm0, %v243_v0  ;;  %v596_v3 = vld [vmem:[#allocation2] sm:$0xff]  ;;  %v598_v6 = vld [vmem:[#allocation2 + $0x10] sm:$0xff]  ;;  %s231_s10 = sand.u32 1, %s1078_s19  }
  0x36   : > { %841 = vmatpush3.msk.msra.mxu0 %vm251_vm0, %v243_v0  ;;  %v880_v5 = vpack.c.bf16 %v597_v4, %v596_v3  ;;  %v599_v7 = vld [vmem:[#allocation2 + $0x18] sm:$0xff]  ;;  %v600_v9 = vld [vmem:[#allocation2 + $0x20] sm:$0xff]  ;;  %v601_v10 = vld [vmem:[#allocation2 + $0x28] sm:$0xff]  ;;  %v1091_v59 = vmov 683565275   ;;  %s818_s14 = sshll.u32 %s1151_s22, 8 }
  0x37   : > { %s1431_s6 = smov (!%p235_p5, %s791_s6), 3  ;;  %v884_v8 = vpack.c.bf16 %v599_v7, %v598_v6  ;;  %v888_v11 = vpack.c.bf16 %v601_v10, %v600_v9  ;;  %v602_v12 = vld [vmem:[#allocation2 + $0x30] sm:$0xff]  ;;  %v603_v13 = vld [vmem:[#allocation2 + $0x38] sm:$0xff]  ;;  %v604_v15 = vld [vmem:[#allocation2 + $0x40] sm:$0xff]  ;;  %v1092_v61 = vmov 2475754826   ;;  %s1361_s17 = scalar_lea.hbm %s1409_s5, %s818_s14 }
  0x38   : > { %s792_s9 = sshll.u32 %s1431_s6, 3  ;;  %881 = vmatprep.subr.bf16.mxu1 %v880_v5  ;;  %v892_v14 = vpack.c.bf16 %v603_v13, %v602_v12  ;;  %v605_v16 = vld [vmem:[#allocation2 + $0x48] sm:$0xff]  ;;  %v606_v18 = vld [vmem:[#allocation2 + $0x50] sm:$0xff]  ;;  %v607_v19 = vld [vmem:[#allocation2 + $0x58] sm:$0xff]  ;;  %v1093_v63 = vmov 2131351028  }
  0x39   : > { %s238_s7 = scalar_lea.vmem %s1404_s0, %s792_s9  ;;  %883 = vmatpush3.bf16.msra.mxu1 %v880_v5  ;;  %v896_v17 = vpack.c.bf16 %v605_v16, %v604_v15  ;;  %v900_v20 = vpack.c.bf16 %v607_v19, %v606_v18  ;;  %v608_v21 = vld [vmem:[#allocation2 + $0x60] sm:$0xff]  ;;  %v609_v22 = vld [vmem:[#allocation2 + $0x68] sm:$0xff]  ;;  %v610_v24 = vld [vmem:[#allocation2 + $0x70] sm:$0xff]  ;;  %v1094_v3 = vmov 2102212464   ;;  %s1363_s23 = scalar_lea.sflag [#allocation4], %s231_s10 }
  0x3a   : > { %v241_v1 = vld [vmem:[%s238_s7] sm:$0xff]  ;;  %v242_v2 = vld [vmem:[%s238_s7 + $0x8] sm:$0xff]  ;;  %885 = vmatprep.subr.bf16.mxu1 %v884_v8  ;;  %v904_v23 = vpack.c.bf16 %v609_v22, %v608_v21  ;;  %v611_v25 = vld [vmem:[#allocation2 + $0x78] sm:$0xff]  ;;  %v1095_v6 = vmov 920167782   ;;  %s790_s7 = sshll.u32 %s231_s10, 4 }
  0x3b   : > { %842 = vmatprep.mubr.msk.f32.mxu0 %vm244_vm1, %v241_v1  ;;  %v908_v26 = vpack.c.bf16 %v611_v25, %v610_v24  ;;  %v796_v27 = vld [vmem:[%s1406_s2] ss:$0 sm:$0xff]  ;;  %v797_v29 = vld [vmem:[%s1406_s2 + $0x1] ss:$0 sm:$0xff]  ;;  %v1096_v9 = vmov 1326507024  }
  0x3c   : > { %843 = vmatmul.mubr.msk.f32.vlgmr.msra.gmra.mrb[0].mxu0 %vm244_vm1, %v242_v2  ;;  %s233_s12 = scalar_lea.vmem [#allocation5], %s790_s7  ;;  %p1424_p9 = scmp.ne.s32.totalorder %s1413_s28, 0 }
  0x3d   : > { %887 = vmatpush3.bf16.msra.mxu1 %v884_v8  ;;  %s710_s13 = sshll.u32 %s233_s12, 4  ;;  %s1097_s22 = smov [#allocation5]   ;;  %s1356_s13 = int_to_ptr.vmem [resolvable:$true] %s710_s13 }
  0x3e   : > { %889 = vmatprep.subr.bf16.mxu1 %v888_v11  ;;  %s1020_s25 = scalar_lea.vmem %s1356_s13, 256  ;;  %s1024_s26 = sshll.u32 %s1097_s22, 4  ;;  %s1025_s26 = int_to_ptr.vmem [resolvable:$false] %s1024_s26 }
  0x3f   : > { %p1021_p6 = scmp.ne.s32.totalorder %s1356_s13, %s1020_s25  ;;  %s1026_s6 = scalar_lea.vmem %s1025_s26, 512 }
  0x40   : > { %p1027_p2 = scmp.lt.s32.totalorder %s1356_s13, %s1025_s26  ;;  %p1028_p3 = scmp.lt.s32.totalorder %s1026_s6, %s1020_s25 }
  0x41   : > { %891 = vmatpush3.bf16.msra.mxu1 %v888_v11  ;;  %p1022_p10 = pnand %p1021_p6, %p1424_p9 }
  0x42   : > { %893 = vmatprep.subr.bf16.mxu1 %v892_v14  ;;  %p1029_p4 = por %p1028_p3, %p1027_p2 }
  0x43   : > { %p1023_p12 = pneg %p1022_p10 }
  0x45   : > { %895 = vmatpush3.bf16.msra.mxu1 %v892_v14  ;;  %p1030_p7 = pnand %p1029_p4, %p1023_p12 }
  0x46   : > { %897 = vmatprep.subr.bf16.mxu1 %v896_v17 }
  0x49   : > { %899 = vmatpush3.bf16.msra.mxu1 %v896_v17 }
  0x4a   : > { %901 = vmatprep.subr.bf16.mxu1 %v900_v20 }
  0x4d   : > { %903 = vmatpush3.bf16.msra.mxu1 %v900_v20 }
  0x4e   : > { %905 = vmatprep.subr.bf16.mxu1 %v904_v23 }
  0x51   : > { %907 = vmatpush3.bf16.msra.mxu1 %v904_v23 }
  0x52   : > { %909 = vmatprep.subr.bf16.mxu1 %v908_v26 }
  0x55   : > { %911 = vmatpush3.bf16.msra.mxu1 %v908_v26 }
 0x10f   : > { %v1223_v28 = vpop.f32.mrb[0].mxu0 }
 0x110   : > { %v1228_v30 = vpop.f32.mrb[1].mxu0  ;;  %v338_v31 = vmul.f32 %v1223_v28, %v796_v27  ;;  %vm331_vm14 = vcmp.gt.f32.partialorder %v1223_v28, 0.0 }
 0x111   : > { %v337_v32 = vmul.f32 %v796_v27, %v1228_v30  ;;  %vm330_vm0 = vcmp.gt.f32.partialorder %v1228_v30, 0.0 }
 0x112   : > { %v1232_v33 = vadd.f32 %v797_v29, %v338_v31 }
 0x113   : > { %v1234_v34 = vadd.f32 %v797_v29, %v337_v32 }
 0x114   : > { %v450_v35 = vand.u32 2147483647, %v1232_v33  ;;  %v453_v36 = vand.u32 2139095040, %v1232_v33 }
 0x115   : > { %v349_v37 = vand.u32 2139095040, %v1234_v34  ;;  %v346_v38 = vand.u32 2147483647, %v1234_v34 }
 0x116   : > { %v454_v39 = vshrl.u32 %v453_v36, 23  ;;  %v457_v42 = vand.u32 8388607, %v450_v35 }
 0x117   : > { %v350_v40 = vshrl.u32 %v349_v37, 23  ;;  %v353_v43 = vand.u32 8388607, %v346_v38 }
 0x118   : > { %v802_v41 = vadd.s32 4294967169, %v454_v39  ;;  %v458_v47 = vor.u32 8388608, %v457_v42 }
 0x119   : > { %v798_v44 = vadd.s32 4294967169, %v350_v40  ;;  %v354_v48 = vor.u32 8388608, %v353_v43 }
 0x11a   : > { %v460_v45 = vadd.s32 1, %v802_v41  ;;  %v1248_v56 = vshll.u32 %v458_v47, 8 }
 0x11b   : > { %v356_v46 = vadd.s32 1, %v798_v44  ;;  %v1250_v57 = vshll.u32 %v354_v48, 8 }
 0x11c   : > { %vm461_vm2 = vcmp.gt.s32.totalorder %v460_v45, 0 }
 0x11d   : > { %vm357_vm3 = vcmp.gt.s32.totalorder %v356_v46, 0  ;;  %v462_v49 = vsel %vm461_vm2, %v460_v45, 0  ;;  %vm452_vm2 = vcmp.lt.s32.totalorder %v1232_v33, 0 }
 0x11e   : > { %v358_v50 = vsel %vm357_vm3, %v356_v46, 0  ;;  %v464_v51 = vand.u32 31, %v462_v49  ;;  %v463_v53 = vshrl.u32 %v462_v49, 5  ;;  %vm1315_vm3 = vcmp.le.f32.partialorder %v450_v35, 0.7853982 }
 0x11f   : > { %v1244_v52 = vand.u32 31, %v358_v50  ;;  %v1246_v54 = vshrl.u32 %v358_v50, 5 }
 0x120   : > { %v465_v55 = vsub.s32 32, %v464_v51  ;;  %v467_v60 = vshll.u32 %v1091_v59, %v464_v51  ;;  %v470_v62 = vshll.u32 %v1092_v61, %v464_v51  ;;  %v473_v0 = vshll.u32 %v1093_v63, %v464_v51 }
 0x121   : > { %v361_v58 = vsub.s32 32, %v1244_v52  ;;  %v476_v5 = vshll.u32 %v1094_v3, %v464_v51  ;;  %v479_v8 = vshll.u32 %v1095_v6, %v464_v51  ;;  %vm482_vm4 = vcmp.lt.s32.totalorder %v463_v53, 1 }
 0x122   : > { %v468_v1 = vshrl.u32 %v1092_v61, %v465_v55  ;;  %v471_v2 = vshrl.u32 %v1093_v63, %v465_v55  ;;  %v474_v4 = vshrl.u32 %v1094_v3, %v465_v55  ;;  %v477_v7 = vshrl.u32 %v1095_v6, %v465_v55 }
 0x123   : > { %v480_v10 = vshrl.u32 %v1096_v9, %v465_v55  ;;  %v466_v11 = vshrl.u32 %v1091_v59, %v465_v55  ;;  %vm484_vm5 = vcmp.lt.s32.totalorder %v463_v53, 3  ;;  %vm485_vm6 = vcmp.lt.s32.totalorder %v463_v53, 4 }
 0x124   : > { %v469_v12 = vor.u32 %v468_v1, %v467_v60  ;;  %v472_v13 = vor.u32 %v471_v2, %v470_v62  ;;  %v475_v14 = vor.u32 %v474_v4, %v473_v0  ;;  %v478_v15 = vor.u32 %v477_v7, %v476_v5 }
 0x125   : > { %v481_v16 = vor.u32 %v480_v10, %v479_v8  ;;  %v364_v24 = vshrl.u32 %v1092_v61, %v361_v58  ;;  %vm483_vm7 = vcmp.lt.s32.totalorder %v463_v53, 2  ;;  %v363_v27 = vshll.u32 %v1091_v59, %v1244_v52 }
 0x126   : > { %v486_v17 = vsel %vm482_vm4, %v466_v11, %v469_v12  ;;  %v487_v18 = vsel %vm485_vm6, %v475_v14, 2102212464  ;;  %v490_v19 = vsel %vm482_vm4, %v469_v12, %v472_v13  ;;  %v494_v20 = vsel %vm482_vm4, %v472_v13, %v475_v14 }
 0x127   : > { %v488_v21 = vsel %vm484_vm5, %v472_v13, %v487_v18  ;;  %v491_v22 = vsel %vm485_vm6, %v478_v15, 920167782  ;;  %v495_v23 = vsel %vm485_vm6, %v481_v16, 1326507024  ;;  %v366_v36 = vshll.u32 %v1092_v61, %v1244_v52 }
 0x128   : > { %v492_v25 = vsel %vm484_vm5, %v475_v14, %v491_v22  ;;  %v496_v26 = vsel %vm484_vm5, %v478_v15, %v495_v23  ;;  %v489_v29 = vsel %vm483_vm7, %v486_v17, %v488_v21  ;;  %v365_v42 = vor.u32 %v364_v24, %v363_v27 }
 0x129   : > { %v493_v31 = vsel %vm483_vm7, %v490_v19, %v492_v25  ;;  %v497_v32 = vsel %vm483_vm7, %v494_v20, %v496_v26  ;;  %v367_v43 = vshrl.u32 %v1093_v63, %v361_v58  ;;  %v369_v44 = vshll.u32 %v1093_v63, %v1244_v52 }
 0x12a   : > { %v1256_v37 = vmul.u32.u64.low %v1248_v56, %v497_v32  ;;  %v1257_v39 = vmul.u32.u64.high %v1248_v56, %v497_v32, %v1256_v37  ;;  %v1260_v40 = vmul.u32.u64.low %v1248_v56, %v493_v31  ;;  %v1261_v41 = vmul.u32.u64.high %v1248_v56, %v493_v31, %v1260_v40 }
 0x12b   : > { %v370_v45 = vshrl.u32 %v1094_v3, %v361_v58  ;;  %v362_v46 = vshrl.u32 %v1091_v59, %v361_v58  ;;  %v372_v47 = vshll.u32 %v1094_v3, %v1244_v52  ;;  %v373_v48 = vshrl.u32 %v1095_v6, %v361_v58 }
 0x12c   : > { %v376_v49 = vshrl.u32 %v1096_v9, %v361_v58  ;;  %v505_v50 = vmul.u32 %v1248_v56, %v489_v29  ;;  %v368_v51 = vor.u32 %v367_v43, %v366_v36  ;;  %v375_v55 = vshll.u32 %v1095_v6, %v1244_v52 }
 0x12d   : > { %v371_v53 = vor.u32 %v370_v45, %v369_v44  ;;  %vm507_vm8 = vc.u32 %v1257_v39, %v1260_v40  ;;  %v508_v60 = vadd.s32 1, %v1261_v41  ;;  %v374_v61 = vor.u32 %v373_v48, %v372_v47 }
 0x12e   : > { %vm378_vm9 = vcmp.lt.s32.totalorder %v1246_v54, 1  ;;  %v377_v62 = vor.u32 %v376_v49, %v375_v55  ;;  %vm380_vm10 = vcmp.lt.s32.totalorder %v1246_v54, 3  ;;  %vm381_vm11 = vcmp.lt.s32.totalorder %v1246_v54, 4  ;;  %v806_v55 = vld [vmem:[%s1406_s2 + $0x5] ss:$0 sm:$0xff] }
 0x12f   : > { %v386_v58 = vsel %vm378_vm9, %v365_v42, %v368_v51  ;;  %v509_v56 = vsel %vm507_vm8, %v508_v60, %v1261_v41  ;;  %v383_v59 = vsel %vm381_vm11, %v371_v53, 2102212464  ;;  %v387_v63 = vsel %vm381_vm11, %v374_v61, 920167782 }
 0x130   : > { %v390_v0 = vsel %vm378_vm9, %v368_v51, %v371_v53  ;;  %v510_v52 = vadd.s32 %v509_v56, %v505_v50  ;;  %vm379_vm12 = vcmp.lt.s32.totalorder %v1246_v54, 2  ;;  %v388_v1 = vsel %vm380_vm10, %v371_v53, %v387_v63 }
 0x131   : > { %v391_v2 = vsel %vm381_vm11, %v377_v62, 1326507024  ;;  %v382_v3 = vsel %vm378_vm9, %v362_v46, %v365_v42  ;;  %v384_v4 = vsel %vm380_vm10, %v368_v51, %v383_v59  ;;  %v389_v5 = vsel %vm379_vm12, %v386_v58, %v388_v1 }
 0x132   : > { %v392_v6 = vsel %vm380_vm10, %v374_v61, %v391_v2  ;;  %v511_v7 = vadd.s32 536870912, %v510_v52  ;;  %v1277_v9 = vmul.u32.u64.low %v1250_v57, %v389_v5  ;;  %v1278_v10 = vmul.u32.u64.high %v1250_v57, %v389_v5, %v1277_v9  ;;  %v807_v2 = vld [vmem:[%s1406_s2 + $0x4] ss:$0 sm:$0xff] }
 0x133   : > { %v393_v8 = vsel %vm379_vm12, %v390_v0, %v392_v6  ;;  %v385_v14 = vsel %vm379_vm12, %v382_v3, %v384_v4  ;;  %v555_v25 = vsel %vm331_vm14, %v1223_v28, 1.0  ;;  %v506_v32 = vadd.s32 %v1260_v40, %v1257_v39 }
 0x134   : > { %v1281_v11 = vmul.u32.u64.low %v1250_v57, %v393_v8  ;;  %v1282_v12 = vmul.u32.u64.high %v1250_v57, %v393_v8, %v1281_v11  ;;  %v1284_v13 = vshrl.u32 %v511_v7, 30  ;;  %v404_v15 = vadd.s32 1, %v1278_v10 }
 0x135   : > { %v401_v16 = vmul.u32 %v1250_v57, %v385_v14  ;;  %980 = vrcp.f32 %v555_v25  ;;  %v554_v48 = vsel %vm330_vm0, %v1228_v30, 1.0  ;;  %vm348_vm4 = vcmp.lt.s32.totalorder %v1234_v34, 0 }
 0x136   : > { %v513_v54 = vshll.u32 %v1284_v13, 30  ;;  %vm403_vm13 = vc.u32 %v1282_v12, %v1277_v9  ;;  %982 = vrcp.f32 %v554_v48  ;;  %v402_v60 = vadd.s32 %v1277_v9, %v1282_v12 }
 0x137   : > { %v405_v18 = vsel %vm403_vm13, %v404_v15, %v1278_v10  ;;  %v536_v56 = vsub.s32 4, %v1284_v13  ;;  %vm1332_vm5 = vcmp.le.f32.partialorder %v346_v38, 0.7853982  ;;  %vm542_vm9 = vweird.f32 %v1232_v33 }
 0x138   : > { %v514_v17 = vsub.s32 %v510_v52, %v513_v54  ;;  %v406_v19 = vadd.s32 %v405_v18, %v401_v16  ;;  %vm438_vm13 = vweird.f32 %v1234_v34 }
 0x139   : > { %v537_v7 = vsel %vm452_vm2, %v536_v56, %v1284_v13  ;;  %v808_v13 = vld [vmem:[%s1406_s2 + $0x3] ss:$0 sm:$0xff]  ;;  %v810_v56 = vld [vmem:[%s1408_s4] ss:$0 sm:$0xff] }
 0x13a   : > { %v516_v20 = vsub.s32 0, %v514_v17  ;;  %v407_v21 = vadd.s32 536870912, %v406_v19  ;;  %v539_v35 = vsel %vm1315_vm3, 0, %v537_v7 }
 0x13b   : > { %v543_v18 = vadd.s32 3, %v539_v35 }
 0x13c   : > { %v803_v22 = vmin.u32 %v516_v20, %v514_v17  ;;  %v1292_v23 = vshrl.u32 %v407_v21, 30 }
 0x13e   : > { %v518_v24 = vclz %v803_v22  ;;  %v409_v57 = vshll.u32 %v1292_v23, 30  ;;  %v432_v15 = vsub.s32 4, %v1292_v23 }
 0x13f   : > { %v981_v39 = vpop.eup %980 }
 0x140   : > { %v804_v26 = vadd.s32 4294967294, %v518_v24  ;;  %v410_v27 = vsub.s32 %v406_v19, %v409_v57  ;;  %v566_v52 = vmul.f32 %v981_v39, %v806_v55  ;;  %v983_v11 = vpop.eup %982  ;;  %v433_v22 = vsel %vm348_vm4, %v432_v15, %v1292_v23  ;;  %v809_v23 = vld [vmem:[%s1406_s2 + $0x2] ss:$0 sm:$0xff] }
 0x142   : > { %vm805_vm15 = vcmp.lt.s32.totalorder %v804_v26, 0  ;;  %v412_v31 = vsub.s32 0, %v410_v27  ;;  %v573_v10 = vadd.f32 %v807_v2, %v566_v52 }
 0x143   : > { %v521_v29 = vsel %vm805_vm15, 0, %v804_v26  ;;  %v544_v26 = vand.u32 3, %v543_v18 }
 0x144   : > { %v522_v36 = vsub.s32 32, %v521_v29  ;;  %v526_v37 = vsub.s32 4294967266, %v521_v29  ;;  %v799_v41 = vmin.u32 %v412_v31, %v410_v27  ;;  %v523_v42 = vshll.u32 %v514_v17, %v521_v29 }
 0x145   : > { %v575_v16 = vmul.f32 %v981_v39, %v573_v10  ;;  %v565_v17 = vmul.f32 %v983_v11, %v806_v55  ;;  %v435_v29 = vsel %vm1332_vm5, 0, %v433_v22  ;;  %vm549_vm6 = vcmp.eq.s32.totalorder %v544_v26, 2 }
 0x146   : > { %v524_v43 = vshrl.u32 %v506_v32, %v522_v36  ;;  %v527_v44 = vadd.s32 127, %v526_v37  ;;  %v414_v45 = vclz %v799_v41  ;;  %v439_v41 = vadd.s32 3, %v435_v29 }
 0x147   : > { %v582_v24 = vadd.f32 %v808_v13, %v575_v16  ;;  %v572_v57 = vadd.f32 %v807_v2, %v565_v17  ;;  %vm546_vm7 = vcmp.eq.s32.totalorder %v544_v26, 0  ;;  %vm545_vm8 = vcmp.lt.s32.totalorder %v544_v26, 2 }
 0x148   : > { %v525_v46 = vor.u32 %v524_v43, %v523_v42  ;;  %v528_v47 = vshll.u32 %v527_v44, 23  ;;  %v800_v49 = vadd.s32 4294967294, %v414_v45  ;;  %v440_v48 = vand.u32 3, %v439_v41 }
 0x149   : > { %v584_v31 = vmul.f32 %v981_v39, %v582_v24  ;;  %v574_v36 = vmul.f32 %v983_v11, %v572_v57 }
 0x14a   : > { %v529_v50 = vor.u32 4788187, %v528_v47  ;;  %vm801_vm1 = vcmp.lt.s32.totalorder %v800_v49, 0  ;;  %v532_v51 = vcvt.s32.f32 %v525_v46  ;;  %vm445_vm10 = vcmp.eq.s32.totalorder %v440_v48, 2 }
 0x14b   : > { %v417_v53 = vsel %vm801_vm1, 0, %v800_v49  ;;  %v591_v44 = vadd.f32 %v809_v23, %v584_v31  ;;  %v581_v46 = vadd.f32 %v808_v13, %v574_v36  ;;  %vm442_vm11 = vcmp.eq.s32.totalorder %v440_v48, 0 }
 0x14c   : > { %v530_v40 = vand.u32 2147483647, %v529_v50  ;;  %v418_v61 = vsub.s32 32, %v417_v53  ;;  %v422_v62 = vsub.s32 4294967266, %v417_v53  ;;  %v419_v59 = vshll.u32 %v410_v27, %v417_v53 }
 0x14d   : > { %vm441_vm12 = vcmp.lt.s32.totalorder %v440_v48, 2 }
 0x14e   : > { %v533_v58 = vmul.f32 %v532_v51, %v530_v40  ;;  %v420_v63 = vshrl.u32 %v402_v60, %v418_v61  ;;  %v423_v0 = vadd.s32 127, %v422_v62  ;;  %v583_v51 = vmul.f32 %v983_v11, %v581_v46 }
 0x150   : > { %v534_v1 = vxor.u32 2147483648, %v533_v58  ;;  %v421_v3 = vor.u32 %v420_v63, %v419_v59  ;;  %v424_v4 = vshll.u32 %v423_v0, 23  ;;  %v590_v61 = vadd.f32 %v809_v23, %v583_v51 }
 0x152   : > { %v535_v6 = vsel %vm452_vm2, %v534_v1, %v533_v58  ;;  %v425_v9 = vor.u32 4788187, %v424_v4  ;;  %v428_v14 = vcvt.s32.f32 %v421_v3 }
 0x153   : > { %v538_v8 = vsel %vm1315_vm3, %v1232_v33, %v535_v6 }
 0x154   : > { %984 = vcosq.f32 %v538_v8  ;;  %v426_v12 = vand.u32 2147483647, %v425_v9 }
 0x155   : > { %986 = vsinq.f32 %v538_v8 }
 0x156   : > { %v429_v54 = vmul.f32 %v428_v14, %v426_v12 }
 0x158   : > { %v430_v19 = vxor.u32 2147483648, %v429_v54 }
 0x15a   : > { %v431_v21 = vsel %vm348_vm4, %v430_v19, %v429_v54 }
 0x15b   : > { %v434_v25 = vsel %vm1332_vm5, %v1234_v34, %v431_v21 }
 0x15c   : > { %988 = vcosq.f32 %v434_v25 }
 0x15d   : > { %990 = vsinq.f32 %v434_v25 }
 0x15e   : > { %v985_v27 = vpop.eup %984 }
 0x15f   : > { %v987_v38 = vpop.eup %986  ;;  %v550_v32 = vxor.u32 2147483648, %v985_v27 }
 0x160   : > { %v547_v37 = vxor.u32 2147483648, %v987_v38 }
 0x161   : > { %v551_v42 = vsel %vm549_vm6, %v550_v32, %v987_v38 }
 0x162   : > { %v548_v43 = vsel %vm546_vm7, %v985_v27, %v547_v37 }
 0x163   : > { %v552_v45 = vsel %vm545_vm8, %v548_v43, %v551_v42 }
 0x164   : > { %v553_v47 = vsel %vm542_vm9, nan, %v552_v45 }
 0x165   : > { %v593_v49 = vmul.f32 %v591_v44, %v553_v47 }
 0x166   : > { %v989_v50 = vpop.eup %988 }
 0x167   : > { %v991_v39 = vpop.eup %990  ;;  %v446_v40 = vxor.u32 2147483648, %v989_v50 }
 0x168   : > { %v443_v53 = vxor.u32 2147483648, %v991_v39 }
 0x169   : > { %v447_v55 = vsel %vm445_vm10, %v446_v40, %v991_v39 }
 0x16a   : > { %v444_v60 = vsel %vm442_vm11, %v989_v50, %v443_v53 }
 0x16b   : > { %v448_v33 = vsel %vm441_vm12, %v444_v60, %v447_v55 }
 0x16c   : > { %v449_v62 = vsel %vm438_vm13, nan, %v448_v33 }
 0x16d   : > { %v592_v58 = vmul.f32 %v590_v61, %v449_v62 }
 0x16f   : > { %877 = vmatprep.mubr.msk.f32.mxu1 %vm330_vm0, %v592_v58 }
 0x170   : > { %878 = vmatmul.mubr.msk.f32.vlgmr.msra.gmra.mrb[0].mxu1 %vm331_vm14, %v593_v49 }
 0x243   : > { %v879_v34 = vpop.f32.mrb[0].mxu1 }
 0x244   : > { %v691_v59 = vadd.f32 %v879_v34, %v810_v56  ;;  %v685_v30 = vpop.f32.mrb[1].mxu1 }
 0x245   : > { %v686_v28 = vadd.f32 %v810_v56, %v685_v30 }
 0x246   : > { %695 = vst [vmem:[%s233_s12 + $0x8] sm:$0xff] %v691_v59 }
 0x247   : > { %694 = vst [vmem:[%s233_s12] sm:$0xff] %v686_v28 }
 0x248   : > { %1033 = shalt.err (!%p1030_p7)
}
 0x249   : > { %s1034_s9 = scalar_lea.hbm %s1361_s17, 256  ;;  %s1038_s7 = scalar_lea.hbm %s1409_s5, 512 }
 0x24a   : > { %p1035_p8 = scmp.ne.s32.totalorder %s1361_s17, %s1034_s9  ;;  %p1039_p1 = scmp.lt.u32.totalorder %s1361_s17, %s1409_s5 }
 0x24b   : > { %p1040_p0 = scmp.lt.u32.totalorder %s1038_s7, %s1034_s9  ;;  %p1042_p6 = scmp.lt.u32.totalorder %s1034_s9, %s1361_s17 }
 0x24c   : > { %p1036_p11 = pnand %p1035_p8, %p1424_p9 }
 0x24d   : > { %p1041_p5 = por %p1040_p0, %p1039_p1 }
 0x24e   : > { %p1037_p13 = pneg %p1036_p11 }
 0x24f   : > { %p1043_p10 = por %p1042_p6, %p1041_p5 }
 0x251   : > { %p1044_p12 = pnand %p1043_p10, %p1037_p13 }
 0x253   : > { %1047 = shalt.err (!%p1044_p12)
}
 0x254   : > { %s1098_s12 = smov 128   ;;  %s1099_s14 = smov 8  }
 0x255   : > { %924 = dma.vmem_to_hbm [thread:$0]  (%p1424_p9), %s1356_s13, 256, %s1361_s17, %s1363_s23, %s1098_s12, %s1098_s12, %s1099_s14  }
 0x256 PF: > { %p936_p2 = scmp.ge.s32.totalorder %s1086_s21, 2  ;;  %s725_s15 = sand.u32 1, %s1074_s18  }
 0x257   : > { %p1425_p3 = scmp.ne.s32.totalorder %s1414_s29, 0  ;;  %s726_s16 = scalar_lea.sflag [#allocation4], %s725_s15 }
 0x259   : > { %p931_p4 = pnand %p936_p2, %p1425_p3 }
 0x25b   : > { %1069 = dma.done.wait (!%p931_p4), %s726_s16, 256  }
 0x25c   : > { %1071 = vsyncadd (!%p931_p4), %s726_s16, 4294967040  ;;  %p16_p7 = scmp.ge.s32.totalorder %s1155_s24, 4   ;;  %s1426_s18 = smov %s1078_s19 }
 0x25d   : > { %s1427_s19 = smov %s1082_s20  ;;  %s1428_s20 = smov %s1166_s27 }
 0x25e   : > { %s1429_s21 = smov %s1155_s24  ;;  %18 = sbr.rel (!%p16_p7) target bundleno = 4 (0x4), region = 80 }
 0x265   :  { %731 = vsyncpa [#allocation3], 1 }
 0x266   :  { %733 = vsyncpa [#allocation3 + $0x1], 1 }
 0x267   :  { %734 = vsyncpa [#allocation4], 1 }
 0x268   :  { %736 = vsyncpa [#allocation4 + $0x1], 1 }

</bundles_post_ra>
